<compile_context>
chip_gen: v7x
topology: tpu7x:2x2x1
jax: 0.10.0
libtpu: 0.0.40
codegen_flags: <defaults>
</compile_context>

<pallas_src>
import numpy as np
import jax
import jax.numpy as jnp
from jax.experimental import pallas as pl
from jax.experimental.pallas import tpu as pltpu


def get_base_matrix_np(n: int) -> np.ndarray:
    """The n x n banded matrix (band + identity), faithful port of the PyTorch helper."""
    assert n >= 4, "get_matrixS indexes i+/-2, so it requires n >= 4 (n_lm >= 8)"
    mat = np.zeros([n, n], dtype=int)
    for row_num in range(1, n + 1):
        i = row_num - 1
        if row_num == 1:
            mat[i][i + 1] = 1
            mat[i][i + 2] = 1
        elif row_num == 2:
            mat[i][i - 1] = 1
            mat[i][i + 2] = 1
        elif row_num == n - 1:
            mat[i][i + 1] = 1
            mat[i][i - 2] = 1
        elif row_num == n:
            mat[i][i - 1] = 1
            mat[i][i - 2] = 1
        elif row_num % 2 == 1:
            mat[i][i + 1] = 1
            mat[i][i + 2] = 1
            mat[i][i - 2] = 1
        elif row_num % 2 == 0:
            mat[i][i - 1] = 1
            mat[i][i + 2] = 1
            mat[i][i - 2] = 1
    mat = mat + np.eye(n, dtype=int)
    return mat.astype(np.float32)


def get_matrix_s_np(n: int) -> np.ndarray:
    """Full constant matrix S (2n x 2n): rows/cols of the base matrix duplicated 2x."""
    mat = get_base_matrix_np(n)
    return np.repeat(np.repeat(mat, 2, 0), 2, 1).astype(np.float32)


def _mm_kernel(x_ref, s_ref, o_ref):
    # x_ref: (TM, D_eff) packed rows, s_ref: (D_eff, D_eff) VMEM-resident constant.
    # One dense MXU matmul per grid step; f32 accumulation matches torch.mm.
    o_ref[...] = jnp.dot(
        x_ref[...], s_ref[...], preferred_element_type=jnp.float32
    ).astype(o_ref.dtype)


def make_mul_matrix_s(n_lm: int, tile_rows: int = 4096, min_pallas_rows: int = 1024):
    """Returns fn(x: [B, n_lm]) -> x @ S, S the constant MVC-Net matrix for n_lm landmarks.

    tile_rows: packed-row tile per grid step (tile block = tile_rows x 128 f32).
               4096 -> 2 MB blocks, ~8 MB double-buffered VMEM: safe on v5e/v6e/v7x.
    min_pallas_rows: batches smaller than this use a plain (fusable) constant matmul
               instead of paying a standalone pallas_call launch.
    """
    assert n_lm % 2 == 0, "n_lm (#landmarks) must be even"
    n = n_lm // 2
    D = n_lm
    assert tile_rows % 8 == 0, "tile_rows must be a multiple of 8 sublanes"

    S_np = get_matrix_s_np(n)  # (D, D) exact 0/1 constant
    # Pack P rows of x into one 128-lane row so the contraction dim fills the vreg
    # lanes and the MXU runs dense; S becomes the block-diagonal kron(I_P, S).
    if D <= 128 and 128 % D == 0:
        P = 128 // D
    else:
        # TODO(synk): for D that does not divide 128 (e.g. n_lm=68) the kernel falls
        # back to the natural (B, D) layout; lanes beyond D are unused in that case.
        P = 1
    D_eff = P * D
    S_eff = jnp.asarray(np.kron(np.eye(P, dtype=np.float32), S_np), dtype=jnp.float32)
    S_small = jnp.asarray(S_np, dtype=jnp.float32)

    @jax.jit
    def apply(x):
        B, Din = x.shape
        assert Din == D, f"expected last dim {D}, got {Din}"
        in_dtype = x.dtype

        # Tiny batches: let XLA constant-fold / fuse the (D x D) matmul for free.
        if B < min_pallas_rows:
            return jnp.dot(
                x.astype(jnp.float32), S_small, preferred_element_type=jnp.float32
            ).astype(in_dtype)

        # Pack rows: (B, D) -> (B/P, P*D). Row-major reshape => no data movement.
        pad_rows = (-B) % P
        xp = jnp.pad(x, ((0, pad_rows), (0, 0))) if pad_rows else x
        Bp = B + pad_rows
        M = Bp // P
        xr = xp.reshape(M, D_eff).astype(jnp.float32)

        # Row tiling: full-array block when small, otherwise multi-MB tiles with a
        # (Pallas-handled) partial last block -- no explicit padding pass over HBM.
        TM = tile_rows if M > tile_rows else M
        grid = (pl.cdiv(M, TM),)

        out_r = pl.pallas_call(
            _mm_kernel,
            out_shape=jax.ShapeDtypeStruct((M, D_eff), jnp.float32),
            grid=grid,
            in_specs=[
                pl.BlockSpec((TM, D_eff), lambda i: (i, 0)),
                pl.BlockSpec((D_eff, D_eff), lambda i: (0, 0)),  # VMEM-resident S
            ],
            out_specs=pl.BlockSpec((TM, D_eff), lambda i: (i, 0)),
            compiler_params=pltpu.CompilerParams(
                dimension_semantics=("parallel",)  # shard batch tiles across v7x TCs
            ),
        )(xr, S_eff)

        out = out_r.reshape(Bp, D)
        if pad_rows:
            out = out[:B]
        return out.astype(in_dtype)

    return apply


if __name__ == "__main__":
    # Small shapes consistent with the module: x is [B, n_lm].
    n_lm = 16  # n = n_lm / 2 = 8
    batch = 8

    S_ref = jnp.asarray(get_matrix_s_np(n_lm // 2))  # (16, 16) f32, reference only

    key = jax.random.PRNGKey(0)
    k1, k2 = jax.random.split(key)
    x = jax.random.normal(k1, (batch, n_lm), dtype=jnp.float32)

    # Force the Pallas path even at the tiny demo shape (min_pallas_rows=0).
    mul_s = make_mul_matrix_s(n_lm, min_pallas_rows=0)
    out = jax.block_until_ready(mul_s(x))
    ref = x @ S_ref
    assert out.shape == (batch, n_lm)
    np.testing.assert_allclose(np.asarray(out), np.asarray(ref), rtol=1e-5, atol=1e-5)

    # Exercise grid > 1 with a partial last block: B=200 -> M=25 packed rows,
    # tile_rows=8 -> 4 grid steps (last one partial).
    mul_s_tiled = make_mul_matrix_s(n_lm, tile_rows=8, min_pallas_rows=0)
    x2 = jax.random.normal(k2, (200, n_lm), dtype=jnp.float32)
    out2 = jax.block_until_ready(mul_s_tiled(x2))
    np.testing.assert_allclose(
        np.asarray(out2), np.asarray(x2 @ S_ref), rtol=1e-5, atol=1e-5
    )

    # Default config (tiny batch takes the fused plain-JAX constant-matmul path).
    mul_s_default = make_mul_matrix_s(n_lm)
    out3 = jax.block_until_ready(mul_s_default(x))
    np.testing.assert_allclose(np.asarray(out3), np.asarray(ref), rtol=1e-5, atol=1e-5)

    print("KERNEL_OK")
</pallas_src>

<mosaic_0001>
module attributes {stable_mosaic.version = 11 : i64} {
  func.func @_mm_kernel(%arg0: i32, %arg1: memref<1x128xf32, #tpu.memory_space<vmem>>, %arg2: memref<128x128xf32, #tpu.memory_space<vmem>>, %arg3: memref<1x128xf32, #tpu.memory_space<vmem>>) attributes {dimension_semantics = [#tpu.dimension_semantics<parallel>], iteration_bounds = array<i64: 1>, scalar_prefetch = 0 : i64, scratch_operands = 0 : i64, tpu.core_type = #tpu.core_type<tc>, window_params = [{transform_indices = @transform_0, window_bounds = array<i64: 1, 128>}, {pipeline_mode = #tpu.pipeline_mode<synchronous>, transform_indices = @transform_1, window_bounds = array<i64: 128, 128>}, {transform_indices = @transform_2, window_bounds = array<i64: 1, 128>}]} {
    %c0 = arith.constant 0 : index
    %c0_0 = arith.constant 0 : index
    %0 = vector.load %arg1[%c0, %c0_0] : memref<1x128xf32, #tpu.memory_space<vmem>>, vector<1x128xf32>
    %c0_1 = arith.constant 0 : index
    %c0_2 = arith.constant 0 : index
    %1 = vector.load %arg2[%c0_1, %c0_2] : memref<128x128xf32, #tpu.memory_space<vmem>>, vector<128x128xf32>
    %cst = arith.constant dense<0.000000e+00> : vector<1x128xf32>
    %2 = tpu.matmul %0, %1, %cst {dimension_numbers = #tpu.dot_dimension_numbers<[1], [0], [0], [1], [0, 0, 1, 1], [], []>} : vector<1x128xf32>, vector<128x128xf32>, vector<1x128xf32> -> vector<1x128xf32>
    %c0_3 = arith.constant 0 : index
    %c0_4 = arith.constant 0 : index
    %3 = vector.load %arg3[%c0_3, %c0_4] : memref<1x128xf32, #tpu.memory_space<vmem>>, vector<1x128xf32>
    tpu.vector_store %arg3[%c0_3, %c0_4], %2 {strides = array<i32>} : memref<1x128xf32, #tpu.memory_space<vmem>>, vector<1x128xf32>,
    return
  }
  func.func @transform_0(%arg0: i32) -> (i32, i32) {
    %c0_i32 = arith.constant 0 : i32
    %c0_i32_0 = arith.constant 0 : i32
    return %arg0, %c0_i32 : i32, i32
  }
  func.func @transform_1(%arg0: i32) -> (i32, i32) {
    %c0_i32 = arith.constant 0 : i32
    %c0_i32_0 = arith.constant 0 : i32
    %c0_i32_1 = arith.constant 0 : i32
    return %c0_i32, %c0_i32_0 : i32, i32
  }
  func.func @transform_2(%arg0: i32) -> (i32, i32) {
    %c0_i32 = arith.constant 0 : i32
    %c0_i32_0 = arith.constant 0 : i32
    return %arg0, %c0_i32 : i32, i32
  }
}

</mosaic_0001>

<bundles_post_ra>
// kernel: apply.1
= control target key start
LH: loop header
LB: loop body
LE: loop exit
PB: predicated region body
PF: predicated region fallthrough
CT: control target
= control target key end

     0   :  { %7 = vsyncpa [#allocation3], 0  ;;  %s224_s9 = smov [#allocation2]   ;;  %s263_s0 = inlined_call_operand.vmem [shape: f32[1,128], index: 0, kind: input, shape index: {}]   ;;  %s264_s1 = inlined_call_operand.hbm [shape: f32[128,128], index: 1, kind: input, shape index: {}]   ;;  %s265_s2 = inlined_call_operand.vmem [shape: f32[1,128], index: 2, kind: output, shape index: {}]  }
   0x1   :  { %s15_s10 = sshll.u32 %s224_s9, 4  ;;  %s200_s13 = scalar_lea.hbm %s264_s1, 2048  ;;  %s16_s10 = int_to_ptr.vmem [resolvable:$true] %s15_s10 }
   0x2   :  { %p201_p0 = scmp.ne.s32.totalorder %s264_s1, %s200_s13  ;;  %p204_p1 = scmp.lt.u32.totalorder %s200_s13, %s264_s1 }
   0x4   :  { %p206_p2 = pnand %p204_p1, %p201_p0 }
   0x6   :  { %209 = shalt.err (!%p206_p2)
}
   0x7   :  { %s210_s18 = scalar_lea.vmem %s16_s10, 2048  ;;  %p215_p4 = scmp.lt.s32.totalorder %s16_s10, %s16_s10 }
   0x8   :  { %p211_p3 = scmp.ne.s32.totalorder %s16_s10, %s210_s18  ;;  %p216_p5 = scmp.lt.s32.totalorder %s210_s18, %s210_s18 }
   0xa   :  { %p217_p6 = por %p216_p5, %p215_p4 }
   0xc   :  { %p218_p7 = pnand %p217_p6, %p211_p3 }
   0xe   :  { %221 = shalt.err (!%p218_p7)
}
   0xf   :  { %s225_s19 = smov 128   ;;  %s226_s20 = smov 8  }
  0x10   :  { %21 = dma.hbm_to_vmem [thread:$0]  %s264_s1, 2048, %s16_s10, [#allocation3], %s225_s19, %s225_s19, %s226_s20  }
  0x11   :  { %222 = dma.done.wait [#allocation3], 2048  }
  0x12   :  { %223 = vsyncadd [#allocation3], 4294965248  ;;  %v227_v0 = vmov 0.0|0.0   ;;  %vm228_vm0 = vmmov 0   ;;  %v229_v1 = vmov 0.0   ;;  %v26_v2 = vld [vmem:[#allocation2] sm:$0xff] }
  0x13   :  { %170 = vmatprep.subr.bf16.mxu0 %v227_v0  ;;  %167 = vmatprep.mubr.msk.f32.mxu0 %vm228_vm0, %v229_v1  ;;  %v27_v3 = vld [vmem:[#allocation2 + $0x8] sm:$0xff]  ;;  %v28_v4 = vld [vmem:[#allocation2 + $0x10] sm:$0xff]  ;;  %v29_v6 = vld [vmem:[#allocation2 + $0x18] sm:$0xff] }
  0x14   :  { %v171_v5 = vpack.c.bf16 %v27_v3, %v26_v2  ;;  %v174_v7 = vpack.c.bf16 %v29_v6, %v28_v4  ;;  %v30_v8 = vld [vmem:[#allocation2 + $0x20] sm:$0xff]  ;;  %v31_v9 = vld [vmem:[#allocation2 + $0x28] sm:$0xff]  ;;  %v32_v11 = vld [vmem:[#allocation2 + $0x30] sm:$0xff] }
  0x15   :  { %v177_v10 = vpack.c.bf16 %v31_v9, %v30_v8  ;;  %v33_v12 = vld [vmem:[#allocation2 + $0x38] sm:$0xff]  ;;  %v34_v14 = vld [vmem:[#allocation2 + $0x40] sm:$0xff]  ;;  %v35_v15 = vld [vmem:[#allocation2 + $0x48] sm:$0xff] }
  0x16   :  { %172 = vmatpush3.bf16.msra.mxu0 %v171_v5  ;;  %v180_v13 = vpack.c.bf16 %v33_v12, %v32_v11  ;;  %v183_v16 = vpack.c.bf16 %v35_v15, %v34_v14  ;;  %v36_v17 = vld [vmem:[#allocation2 + $0x50] sm:$0xff]  ;;  %v37_v18 = vld [vmem:[#allocation2 + $0x58] sm:$0xff]  ;;  %v38_v20 = vld [vmem:[#allocation2 + $0x60] sm:$0xff] }
  0x17   :  { %173 = vmatprep.subr.bf16.mxu0 %v227_v0  ;;  %v186_v19 = vpack.c.bf16 %v37_v18, %v36_v17  ;;  %v39_v21 = vld [vmem:[#allocation2 + $0x68] sm:$0xff]  ;;  %v40_v23 = vld [vmem:[#allocation2 + $0x70] sm:$0xff]  ;;  %v41_v24 = vld [vmem:[#allocation2 + $0x78] sm:$0xff] }
  0x18   :  { %v189_v22 = vpack.c.bf16 %v39_v21, %v38_v20  ;;  %v192_v25 = vpack.c.bf16 %v41_v24, %v40_v23  ;;  %v25_v26 = vld [vmem:[%s263_s0] sm:$0x1] }
  0x1a   :  { %175 = vmatpush3.bf16.msra.mxu0 %v174_v7 }
  0x1b   :  { %176 = vmatprep.subr.bf16.mxu0 %v227_v0 }
  0x1e   :  { %178 = vmatpush3.bf16.msra.mxu0 %v177_v10 }
  0x1f   :  { %179 = vmatprep.subr.bf16.mxu0 %v227_v0 }
  0x22   :  { %181 = vmatpush3.bf16.msra.mxu0 %v180_v13 }
  0x23   :  { %182 = vmatprep.subr.bf16.mxu0 %v227_v0 }
  0x26   :  { %184 = vmatpush3.bf16.msra.mxu0 %v183_v16 }
  0x27   :  { %185 = vmatprep.subr.bf16.mxu0 %v227_v0 }
  0x2a   :  { %187 = vmatpush3.bf16.msra.mxu0 %v186_v19 }
  0x2b   :  { %188 = vmatprep.subr.bf16.mxu0 %v227_v0 }
  0x2e   :  { %190 = vmatpush3.bf16.msra.mxu0 %v189_v22 }
  0x2f   :  { %191 = vmatprep.subr.bf16.mxu0 %v227_v0 }
  0x32   :  { %193 = vmatpush3.bf16.msra.mxu0 %v192_v25 }
  0x35   :  { %168 = vmatmul.mubr.f32.vlgmr.msra.gmra.mrb[0].mxu0 %v25_v26 }
 0x108   :  { %v108_v27 = vpop.f32.mrb[0].mxu0 }
 0x109   :  { %112 = vst [vmem:[%s265_s2] sm:$0x1] %v108_v27  ;;  %v169_v28 = vpop.f32.mrb[1].mxu0 }
 0x10a   :  { %117 = vsyncpa [#allocation3], 1 }

</bundles_post_ra>
